<compile_context>
chip_gen: v6e
topology: v6e:2x2x1
jax: 0.10.0
libtpu: 0.0.40
codegen_flags: <defaults>
</compile_context>

<pallas_src>
import functools

import jax
import jax.numpy as jnp
from jax.experimental import pallas as pl
from jax.experimental.pallas import tpu as pltpu


def _round_up(x, m):
    return ((x + m - 1) // m) * m


def _pick_tk(d_pad, budget_bytes=20 * 1024 * 1024):
    """Largest 128-multiple divisor of d_pad whose double-buffered bf16
    weight tile (2 * tk * d_pad * 2 bytes) fits budget_bytes."""
    tk = d_pad
    while tk >= 128:
        if d_pad % tk == 0 and 4 * tk * d_pad <= budget_bytes:
            return tk
        tk -= 128
    return 128


# ---------------------------------------------------------------------------
# Fused kernel: y = fc4(fc3(fc2(fc1(x))))   (4 Linear layers, bias included)
# Grid: (M blocks, layer, K blocks).  o_ref (f32) is the resident accumulator
# across (layer, K); act_ref (bf16 scratch) carries the activation between
# layers without touching HBM.
# ---------------------------------------------------------------------------
def _fused_net_kernel(x_ref, w_ref, b_ref, o_ref, act_ref, *, tk):
    l = pl.program_id(1)          # layer index
    k = pl.program_id(2)          # reduction (K) block index
    nl = pl.num_programs(1)
    nk = pl.num_programs(2)

    # Load the (bf16) input activation once per M block.
    @pl.when(jnp.logical_and(l == 0, k == 0))
    def _():
        act_ref[...] = x_ref[...]

    # Start each layer's accumulation from the bias (no extra acc scratch).
    @pl.when(k == 0)
    def _():
        o_ref[...] = jnp.broadcast_to(b_ref[0], o_ref.shape)

    off = pl.multiple_of(k * tk, tk)
    o_ref[...] += jnp.dot(
        act_ref[:, pl.ds(off, tk)], w_ref[0], preferred_element_type=jnp.float32
    )

    # Layer finished: its output becomes the next layer's VMEM-resident input.
    @pl.when(jnp.logical_and(k == nk - 1, l + 1 < nl))
    def _():
        act_ref[...] = o_ref[...].astype(act_ref.dtype)


# ---------------------------------------------------------------------------
# Parameter packing (done once, outside the forward pass)
# ---------------------------------------------------------------------------
def prepare_params(params):
    """params: list of (w, b) with PyTorch convention w:(out,in), b:(out,).

    Returns:
      w_stack: (L, D_pad, D_pad) bf16, (in, out) layout, zero-padded
      b_stack: (L, 1, D_pad)  f32, zero-padded
      d_pad, tk
    """
    dim = params[0][0].shape[0]
    d_pad = _round_up(dim, 128)
    tk = _pick_tk(d_pad)
    pad = d_pad - dim
    w_stack = jnp.stack(
        [jnp.pad(w.T, ((0, pad), (0, pad))).astype(jnp.bfloat16) for w, _ in params]
    )
    b_stack = jnp.stack(
        [jnp.pad(b, (0, pad)).reshape(1, d_pad).astype(jnp.float32) for _, b in params]
    )
    return w_stack, b_stack, d_pad, tk


# ---------------------------------------------------------------------------
# Forward pass (use_checkpoint / replicate only affect backward, not forward)
# ---------------------------------------------------------------------------
@functools.partial(jax.jit, static_argnames=("dim", "d_pad", "tk"))
def net_forward(x, w_stack, b_stack, *, dim, d_pad, tk):
    m = x.shape[0]
    num_layers = w_stack.shape[0]
    # bf16 LHS packs 16 rows/vreg; cap tm at 512 so any batch <= 512 is a
    # single M block and the weight stack streams from HBM exactly once.
    tm = _round_up(min(m, 512), 16)
    m_pad = _round_up(m, tm)
    nm = m_pad // tm
    nk = d_pad // tk

    x_p = jnp.pad(x, ((0, m_pad - m), (0, d_pad - dim))).astype(jnp.bfloat16)

    cost = pl.CostEstimate(
        flops=2 * m_pad * d_pad * d_pad * num_layers,
        transcendentals=0,
        bytes_accessed=(
            nm * num_layers * d_pad * d_pad * 2      # bf16 weights (dominant)
            + m_pad * d_pad * 2                      # x in
            + m_pad * d_pad * 4                      # out
            + num_layers * d_pad * 4                 # biases
        ),
    )

    out = pl.pallas_call(
        functools.partial(_fused_net_kernel, tk=tk),
        out_shape=jax.ShapeDtypeStruct((m_pad, d_pad), jnp.float32),
        grid_spec=pltpu.PrefetchScalarGridSpec(
            num_scalar_prefetch=0,
            grid=(nm, num_layers, nk),
            in_specs=[
                # bf16 activation row-block, resident across (layer, k)
                pl.BlockSpec((tm, d_pad), lambda i, l, k: (i, 0)),
                # bf16 weight tile (tk, d_pad), streamed per (layer, k)
                pl.BlockSpec((1, tk, d_pad), lambda i, l, k: (l, k, 0)),
                # bias row of the current layer
                pl.BlockSpec((1, 1, d_pad), lambda i, l, k: (l, 0, 0)),
            ],
            out_specs=pl.BlockSpec((tm, d_pad), lambda i, l, k: (i, 0)),
            scratch_shapes=[pltpu.VMEM((tm, d_pad), jnp.bfloat16)],
        ),
        compiler_params=pltpu.CompilerParams(
            dimension_semantics=("parallel", "arbitrary", "arbitrary"),
            vmem_limit_bytes=32 * 1024 * 1024,
        ),
        cost_estimate=cost,
    )(x_p, w_stack, b_stack)
    return out[:m, :dim]


# ---------------------------------------------------------------------------
# Reference & init
# ---------------------------------------------------------------------------
def init_net_params(key, dim, dtype=jnp.float32):
    """Deterministic init mimicking nn.Linear default (uniform +-1/sqrt(in))."""
    params = []
    bound = 1.0 / float(dim) ** 0.5
    for layer_key in jax.random.split(key, 4):
        wk, bk = jax.random.split(layer_key)
        w = jax.random.uniform(wk, (dim, dim), dtype, -bound, bound)  # (out, in)
        b = jax.random.uniform(bk, (dim,), dtype, -bound, bound)
        params.append((w, b))
    return params


def net_reference(x, params):
    """Mirrors kernel numerics: bf16 matmul inputs, f32 accumulation."""
    h = x.astype(jnp.float32)
    for w, b in params:
        lhs = h.astype(jnp.bfloat16).astype(jnp.float32)
        rhs = w.T.astype(jnp.bfloat16).astype(jnp.float32)
        h = jnp.dot(lhs, rhs, precision=jax.lax.Precision.HIGHEST) + b
    return h


if __name__ == "__main__":
    # TODO(synk): torch.utils.checkpoint / replicate(DDP) only affect backward;
    # the forward pass is identical, so they are intentionally no-ops here.
    # Second config (dim=200) exercises the DIM=2000-style non-divisible padding.
    for batch, dim in ((16, 256), (4, 200)):
        key = jax.random.PRNGKey(0)
        xkey, pkey = jax.random.split(key)
        x = jax.random.normal(xkey, (batch, dim), jnp.float32)
        params = init_net_params(pkey, dim)

        w_stack, b_stack, d_pad, tk = prepare_params(params)
        out = net_forward(x, w_stack, b_stack, dim=dim, d_pad=d_pad, tk=tk)
        jax.block_until_ready(out)

        ref = net_reference(x, params)
        assert out.shape == (batch, dim)
        err = float(jnp.max(jnp.abs(out - ref)))
        assert jnp.allclose(out, ref, atol=1e-2, rtol=1e-2), (
            f"mismatch vs reference at batch={batch}, dim={dim}: max abs err {err}"
        )

    print("KERNEL_OK")
</pallas_src>

<mosaic_0001>
module attributes {stable_mosaic.version = 11 : i64} {
  func.func @_fused_net_kernel(%arg0: i32, %arg1: i32, %arg2: i32, %arg3: memref<16x256xbf16, #tpu.memory_space<vmem>>, %arg4: memref<1x256x256xbf16, #tpu.memory_space<vmem>>, %arg5: memref<1x1x256xf32, #tpu.memory_space<vmem>>, %arg6: memref<16x256xf32, #tpu.memory_space<vmem>>, %arg7: memref<16x256xbf16, #tpu.memory_space<vmem>>) attributes {dimension_semantics = [#tpu.dimension_semantics<parallel>, #tpu.dimension_semantics<arbitrary>, #tpu.dimension_semantics<arbitrary>], iteration_bounds = array<i64: 1, 4, 1>, scalar_prefetch = 0 : i64, scratch_operands = 1 : i64, tpu.core_type = #tpu.core_type<tc>, window_params = [{transform_indices = @transform_0, window_bounds = array<i64: 16, 256>}, {transform_indices = @transform_1, window_bounds = array<i64: 1, 256, 256>}, {transform_indices = @transform_2, window_bounds = array<i64: 1, 1, 256>}, {transform_indices = @transform_3, window_bounds = array<i64: 16, 256>}]} {
    %c0_i32 = arith.constant 0 : i32
    %0 = arith.cmpi eq, %arg1, %c0_i32 : i32
    %c0_i32_0 = arith.constant 0 : i32
    %1 = arith.cmpi eq, %arg2, %c0_i32_0 : i32
    %2 = arith.andi %0, %1 : i1
    %3 = arith.extui %2 : i1 to i32
    %c0_i32_1 = arith.constant 0 : i32
    %4 = arith.cmpi ne, %3, %c0_i32_1 : i32
    scf.if %4 {
      %c0_13 = arith.constant 0 : index
      %c0_14 = arith.constant 0 : index
      %24 = vector.load %arg3[%c0_13, %c0_14] : memref<16x256xbf16, #tpu.memory_space<vmem>>, vector<16x256xbf16>
      %c0_15 = arith.constant 0 : index
      %c0_16 = arith.constant 0 : index
      %25 = vector.load %arg7[%c0_15, %c0_16] : memref<16x256xbf16, #tpu.memory_space<vmem>>, vector<16x256xbf16>
      tpu.vector_store %arg7[%c0_15, %c0_16], %24 {strides = array<i32>} : memref<16x256xbf16, #tpu.memory_space<vmem>>, vector<16x256xbf16>,
    } else {
    }
    %c0_i32_2 = arith.constant 0 : i32
    %5 = arith.cmpi eq, %arg2, %c0_i32_2 : i32
    %6 = arith.extui %5 : i1 to i32
    %c0_i32_3 = arith.constant 0 : i32
    %7 = arith.cmpi ne, %6, %c0_i32_3 : i32
    scf.if %7 {
      %c0_13 = arith.constant 0 : index
      %c0_14 = arith.constant 0 : index
      %c0_15 = arith.constant 0 : index
      %24 = vector.load %arg5[%c0_13, %c0_14, %c0_15] : memref<1x1x256xf32, #tpu.memory_space<vmem>>, vector<1x1x256xf32>
      %25 = vector.shape_cast %24 : vector<1x1x256xf32> to vector<1x256xf32>
      %26 = vector.shape_cast %25 : vector<1x256xf32> to vector<1x256xf32>
      %27 = vector.broadcast %26 : vector<1x256xf32> to vector<16x256xf32>
      %c0_16 = arith.constant 0 : index
      %c0_17 = arith.constant 0 : index
      %28 = vector.load %arg6[%c0_16, %c0_17] : memref<16x256xf32, #tpu.memory_space<vmem>>, vector<16x256xf32>
      tpu.vector_store %arg6[%c0_16, %c0_17], %27 {strides = array<i32>} : memref<16x256xf32, #tpu.memory_space<vmem>>, vector<16x256xf32>,
    } else {
    }
    %c256_i32 = arith.constant 256 : i32
    %8 = arith.muli %arg2, %c256_i32 : i32
    %9 = tpu.assume_multiple %8, 256 : i32
    %c0 = arith.constant 0 : index
    %c0_4 = arith.constant 0 : index
    %10 = vector.load %arg6[%c0, %c0_4] : memref<16x256xf32, #tpu.memory_space<vmem>>, vector<16x256xf32>
    %c0_5 = arith.constant 0 : index
    %11 = arith.index_cast %9 : i32 to index
    %12 = vector.load %arg7[%c0_5, %11] : memref<16x256xbf16, #tpu.memory_space<vmem>>, vector<16x256xbf16>
    %c0_6 = arith.constant 0 : index
    %c0_7 = arith.constant 0 : index
    %c0_8 = arith.constant 0 : index
    %13 = vector.load %arg4[%c0_6, %c0_7, %c0_8] : memref<1x256x256xbf16, #tpu.memory_space<vmem>>, vector<1x256x256xbf16>
    %14 = vector.shape_cast %13 : vector<1x256x256xbf16> to vector<256x256xbf16>
    %cst = arith.constant dense<0.000000e+00> : vector<16x256xf32>
    %15 = tpu.matmul %12, %14, %cst {dimension_numbers = #tpu.dot_dimension_numbers<[1], [0], [0], [1], [0, 0, 1, 1], [], []>} : vector<16x256xbf16>, vector<256x256xbf16>, vector<16x256xf32> -> vector<16x256xf32>
    %16 = arith.addf %10, %15 : vector<16x256xf32>
    %c0_9 = arith.constant 0 : index
    %c0_10 = arith.constant 0 : index
    %17 = vector.load %arg6[%c0_9, %c0_10] : memref<16x256xf32, #tpu.memory_space<vmem>>, vector<16x256xf32>
    tpu.vector_store %arg6[%c0_9, %c0_10], %16 {strides = array<i32>} : memref<16x256xf32, #tpu.memory_space<vmem>>, vector<16x256xf32>,
    %c0_i32_11 = arith.constant 0 : i32
    %18 = arith.cmpi eq, %arg2, %c0_i32_11 : i32
    %c1_i32 = arith.constant 1 : i32
    %19 = arith.addi %arg1, %c1_i32 : i32
    %c4_i32 = arith.constant 4 : i32
    %20 = arith.cmpi slt, %19, %c4_i32 : i32
    %21 = arith.andi %18, %20 : i1
    %22 = arith.extui %21 : i1 to i32
    %c0_i32_12 = arith.constant 0 : i32
    %23 = arith.cmpi ne, %22, %c0_i32_12 : i32
    scf.if %23 {
      %c0_13 = arith.constant 0 : index
      %c0_14 = arith.constant 0 : index
      %24 = vector.load %arg6[%c0_13, %c0_14] : memref<16x256xf32, #tpu.memory_space<vmem>>, vector<16x256xf32>
      %25 = arith.truncf %24 : vector<16x256xf32> to vector<16x256xbf16>
      %c0_15 = arith.constant 0 : index
      %c0_16 = arith.constant 0 : index
      %26 = vector.load %arg7[%c0_15, %c0_16] : memref<16x256xbf16, #tpu.memory_space<vmem>>, vector<16x256xbf16>
      tpu.vector_store %arg7[%c0_15, %c0_16], %25 {strides = array<i32>} : memref<16x256xbf16, #tpu.memory_space<vmem>>, vector<16x256xbf16>,
    } else {
    }
    return
  }
  func.func @transform_0(%arg0: i32, %arg1: i32, %arg2: i32) -> (i32, i32) {
    %c0_i32 = arith.constant 0 : i32
    %c0_i32_0 = arith.constant 0 : i32
    return %arg0, %c0_i32 : i32, i32
  }
  func.func @transform_1(%arg0: i32, %arg1: i32, %arg2: i32) -> (i32, i32, i32) {
    %c0_i32 = arith.constant 0 : i32
    %c0_i32_0 = arith.constant 0 : i32
    return %arg1, %arg2, %c0_i32 : i32, i32, i32
  }
  func.func @transform_2(%arg0: i32, %arg1: i32, %arg2: i32) -> (i32, i32, i32) {
    %c0_i32 = arith.constant 0 : i32
    %c0_i32_0 = arith.constant 0 : i32
    %c0_i32_1 = arith.constant 0 : i32
    return %arg1, %c0_i32, %c0_i32_0 : i32, i32, i32
  }
  func.func @transform_3(%arg0: i32, %arg1: i32, %arg2: i32) -> (i32, i32) {
    %c0_i32 = arith.constant 0 : i32
    %c0_i32_0 = arith.constant 0 : i32
    return %arg0, %c0_i32 : i32, i32
  }
}

</mosaic_0001>

<bundles_post_ra>
// kernel: net_forward.1
= control target key start
LH: loop header
LB: loop body
LE: loop exit
PB: predicated region body
PF: predicated region fallthrough
CT: control target
= control target key end

     0   :  { %8 = vsyncpa [#allocation4], 0  ;;  %s1150_s0 = inlined_call_operand.vmem [shape: bf16[16,256], index: 0, kind: input, shape index: {}]   ;;  %s1151_s1 = inlined_call_operand.hbm [shape: bf16[4,256,256], index: 1, kind: input, shape index: {}]   ;;  %s1152_s2 = inlined_call_operand.vmem [shape: f32[4,1,256], index: 2, kind: input, shape index: {}]   ;;  %s1153_s3 = inlined_call_operand.hbm [shape: f32[16,256], index: 3, kind: output, shape index: {}]  }
   0x1   :  { %10 = vsyncpa [#allocation4 + $0x1], 0 }
   0x2   :  { %11 = vsyncpa [#allocation5], 0  ;;  %s984_s12 = smov 0   ;;  %s986_s13 = smov 0  }
   0x3   :  { %s988_s14 = smov 0   ;;  %s990_s15 = smov 0  }
   0x4   :  { %s992_s16 = smov 0   ;;  %s994_s17 = smov 0  }
   0x5 LB: > { %s676_s18 = sadd.s32 4294967295, %s956_s17   ;;  %s32_s19 = sadd.s32 1, %s952_s16  ;;  %s956_s17 = sphi %s994_s17, %s17_s17   ;;  %s952_s16 = sphi %s992_s16, %s1163_s16   ;;  %s948_s15 = sphi %s990_s15, %s1162_s15   ;;  %s944_s14 = sphi %s988_s14, %s1161_s14   ;;  %s940_s13 = sphi %s986_s13, %s1160_s13   ;;  %s936_s12 = sphi %s984_s12, %s1159_s12  }
   0x6   : > { %p34_p0 = scmp.ge.s32.totalorder %s32_s19, 4  ;;  %s71_s20 = sadd.s32 1, %s944_s14 }
   0x7   : > { %p78_p1 = scmp.ne.s32.totalorder %s944_s14, %s940_s13  ;;  %p79_p2 = scmp.eq.s32.totalorder %s956_s17, 0 }
   0x8   : > { %s1165_s19 = smov (%p34_p0, %s32_s19), 0  ;;  %p84_p4 = scmp.ne.s32.totalorder %s940_s13, %s936_s12 }
   0x9   : > { %p1020_p3 = por %p79_p2, %p78_p1  ;;  %s66_s22 = ssub.s32 %s952_s16, %s1165_s19 }
   0xa   : > { %p85_p5 = scmp.eq.s32.totalorder %s676_s18, 0  ;;  %p69_p6 = scmp.eq.s32.totalorder %s66_s22, 0 }
   0xb   : > { %p743_p8 = scmp.lt.s32.totalorder %s956_s17, 4  ;;  %s170_s25 = sand.u32 1, %s944_s14  }
   0xc   : > { %p1029_p7 = por %p85_p5, %p84_p4  ;;  %s728_s26 = sshll.u32 %s952_s16, 12 }
   0xd   : > { %s1035_s24 = scalar_select %p69_p6, %s944_s14, %s71_s20  }
   0xe   : > { %s680_s27 = sshll.u32 %s170_s25, 8  ;;  %s183_s30 = scalar_lea.hbm %s1151_s1, %s728_s26 }
   0xf   : > { %s174_s4 = scalar_lea.vmem [#allocation3], %s680_s27  ;;  %p1044_p9 = pnand %p743_p8, %p1020_p3 }
  0x10   : > { %s184_s5 = sshll.u32 %s174_s4, 4  ;;  %s171_s7 = scalar_lea.sflag [#allocation4], %s170_s25  ;;  %s185_s5 = int_to_ptr.vmem [resolvable:$true] %s184_s5 }
  0x11   : > { %p852_p10 = pneg %p1044_p9  ;;  %s863_s8 = scalar_lea.vmem %s185_s5, 4096 }
  0x12   : > { %p864_p11 = scmp.ne.s32.totalorder %s185_s5, %s863_s8  ;;  %s958_s9 = smov [#allocation3]  }
  0x13   : > { %s868_s10 = sshll.u32 %s958_s9, 4  ;;  %s869_s10 = int_to_ptr.vmem [resolvable:$false] %s868_s10 }
  0x14   : > { %p866_p12 = pnand %p864_p11, %p852_p10  ;;  %s870_s11 = scalar_lea.vmem %s869_s10, 8192 }
  0x15   : > { %p871_p0 = scmp.lt.s32.totalorder %s185_s5, %s869_s10  ;;  %p872_p1 = scmp.lt.s32.totalorder %s870_s11, %s863_s8 }
  0x16   : > { %p867_p13 = pneg %p866_p12 }
  0x17   : > { %p873_p2 = por %p872_p1, %p871_p0 }
  0x19   : > { %p874_p3 = pnand %p873_p2, %p867_p13 }
  0x1b   : > { %877 = shalt.err (!%p874_p3)
}
  0x1c   : > { %s959_s12 = smov 128   ;;  %s960_s20 = smov 8  }
  0x1d   : > { %742 = dma.hbm_to_vmem [thread:$0]  (!%p1044_p9), %s183_s30, 4096, %s185_s5, %s171_s7, %s959_s12, %s959_s12, %s960_s20  }
  0x1e   : > { %p683_p4 = scmp.ge.s32.totalorder %s956_s17, 1  ;;  %p199_p5 = scmp.lt.s32.totalorder %s956_s17, 5 }
  0x20   : > { %p200_p6 = pnand %p683_p4, %p199_p5 }
  0x21   : > { %s205_s21 = sand.u32 (!%p200_p6), 1, %s940_s13  }
  0x22   : > { %203 = sbr.rel (%p200_p6) target bundleno = 341 (0x155), region = 32  ;;  %s684_s22 = sshll.u32 (!%p200_p6), %s205_s21, 8 }
  0x23   : > { %s206_s25 = scalar_lea.sflag (!%p200_p6), [#allocation4], %s205_s21  ;;  %s1055_s26 = scalar_lea.vmem (!%p200_p6), [#allocation3], %s684_s22 }
  0x27   : > { %927 = dma.done.wait (%p1029_p7), %s206_s25, 4096  }
  0x28   : > { %929 = vsyncadd (%p1029_p7), %s206_s25, 4294963200  ;;  %p245_p8 = scmp.lt.s32.totalorder %s948_s15, 3  ;;  %p250_p9 = scmp.eq.s32.totalorder %s948_s15, 0 }
  0x29   : > { %v256_v0 = vld [vmem:[%s1150_s0] sm:$0xff] (%p250_p9)  ;;  %v257_v1 = vld [vmem:[%s1150_s0 + $0x8] sm:$0xff] (%p250_p9) }
  0x2a   : > { %s246_s27 = scalar_select %p245_p8, %s948_s15, 3  ;;  %258 = vst [vmem:[#allocation2] sm:$0xff] (%p250_p9), %v256_v0  ;;  %259 = vst [vmem:[#allocation2 + $0x8] sm:$0xff] (%p250_p9), %v257_v1 }
  0x2b   : > { %255 = sbr.rel (!%p250_p9) target bundleno = 48 (0x30), region = 40 }
  0x2c   : > { %s685_s28 = sshll.u32 %s246_s27, 1 }
  0x2d   : > { %s1067_s4 = scalar_lea.vmem %s1152_s2, %s685_s28 }
  0x30 PF: > { %v799_v2 = vld [vmem:[%s1055_s26 + $0x74] ss:$8 sps:$4 sm:$0xff]   ;;  %v801_v3 = vld [vmem:[%s1055_s26 + $0x70] ss:$8 sps:$4 sm:$0xff]   ;;  %v802_v4 = vld [vmem:[%s1055_s26 + $0x64] ss:$8 sps:$4 sm:$0xff]   ;;  %v265_v36 = vlaneseq }
  0x31   : > { %492 = vmatprep.subr.bf16.mxu0 %v799_v2  ;;  %v804_v5 = vld [vmem:[%s1055_s26 + $0x60] ss:$8 sps:$4 sm:$0xff]   ;;  %v805_v6 = vld [vmem:[%s1055_s26 + $0x54] ss:$8 sps:$4 sm:$0xff]   ;;  %v807_v7 = vld [vmem:[%s1055_s26 + $0x50] ss:$8 sps:$4 sm:$0xff]  }
  0x32   : > { %493 = vmatpush1.bf16.msra.mxu0 %v801_v3  ;;  %v808_v8 = vld [vmem:[%s1055_s26 + $0x44] ss:$8 sps:$4 sm:$0xff]   ;;  %v810_v9 = vld [vmem:[%s1055_s26 + $0x40] ss:$8 sps:$4 sm:$0xff]   ;;  %v811_v10 = vld [vmem:[%s1055_s26 + $0x34] ss:$8 sps:$4 sm:$0xff]  }
  0x33   : > { %494 = vmatprep.subr.bf16.mxu0 %v802_v4  ;;  %v813_v11 = vld [vmem:[%s1055_s26 + $0x30] ss:$8 sps:$4 sm:$0xff]   ;;  %v814_v12 = vld [vmem:[%s1055_s26 + $0x24] ss:$8 sps:$4 sm:$0xff]   ;;  %v816_v13 = vld [vmem:[%s1055_s26 + $0x20] ss:$8 sps:$4 sm:$0xff]  }
  0x34   : > { %v817_v14 = vld [vmem:[%s1055_s26 + $0x14] ss:$8 sps:$4 sm:$0xff]   ;;  %v819_v16 = vld [vmem:[%s1055_s26 + $0x10] ss:$8 sps:$4 sm:$0xff]   ;;  %v820_v17 = vld [vmem:[%s1055_s26 + $0x4] ss:$8 sps:$4 sm:$0xff]  }
  0x35   : > { %v849_v15 = vld [vmem:[#allocation2 + $0x4] ss:$8 sps:$4 sm:$0xff]   ;;  %v822_v18 = vld [vmem:[%s1055_s26] ss:$8 sps:$4 sm:$0xff]   ;;  %v825_v20 = vld [vmem:[%s1055_s26 + $0xf0] ss:$8 sps:$4 sm:$0xff]  }
  0x36   : > { %495 = vmatpush1.bf16.msra.mxu0 %v804_v5  ;;  %524 = vmatprep.mubr.bf16.mxu0 %v849_v15  ;;  %v823_v19 = vld [vmem:[%s1055_s26 + $0xf4] ss:$8 sps:$4 sm:$0xff]   ;;  %v826_v21 = vld [vmem:[%s1055_s26 + $0xe4] ss:$8 sps:$4 sm:$0xff]   ;;  %v828_v22 = vld [vmem:[%s1055_s26 + $0xe0] ss:$8 sps:$4 sm:$0xff]  }
  0x37   : > { %496 = vmatprep.subr.bf16.mxu0 %v805_v6  ;;  %v829_v23 = vld [vmem:[%s1055_s26 + $0xd4] ss:$8 sps:$4 sm:$0xff]   ;;  %v831_v24 = vld [vmem:[%s1055_s26 + $0xd0] ss:$8 sps:$4 sm:$0xff]   ;;  %v832_v25 = vld [vmem:[%s1055_s26 + $0xc4] ss:$8 sps:$4 sm:$0xff]  }
  0x38   : > { %v834_v26 = vld [vmem:[%s1055_s26 + $0xc0] ss:$8 sps:$4 sm:$0xff]   ;;  %v835_v27 = vld [vmem:[%s1055_s26 + $0xb4] ss:$8 sps:$4 sm:$0xff]   ;;  %v837_v28 = vld [vmem:[%s1055_s26 + $0xb0] ss:$8 sps:$4 sm:$0xff]  }
  0x39   : > { %v838_v29 = vld [vmem:[%s1055_s26 + $0xa4] ss:$8 sps:$4 sm:$0xff]   ;;  %v840_v30 = vld [vmem:[%s1055_s26 + $0xa0] ss:$8 sps:$4 sm:$0xff]   ;;  %v841_v31 = vld [vmem:[%s1055_s26 + $0x94] ss:$8 sps:$4 sm:$0xff]  }
  0x3a   : > { %497 = vmatpush1.bf16.msra.mxu0 %v807_v7  ;;  %v843_v32 = vld [vmem:[%s1055_s26 + $0x90] ss:$8 sps:$4 sm:$0xff]   ;;  %v844_v33 = vld [vmem:[%s1055_s26 + $0x84] ss:$8 sps:$4 sm:$0xff]   ;;  %v846_v34 = vld [vmem:[%s1055_s26 + $0x80] ss:$8 sps:$4 sm:$0xff]  }
  0x3b   : > { %498 = vmatprep.subr.bf16.mxu0 %v808_v8  ;;  %v847_v35 = vld [vmem:[#allocation2] ss:$8 sps:$4 sm:$0xff]   ;;  %s543_s8 = sadd.s32 1, %s948_s15  ;;  %v266_v37 = vshrl.u32 %v265_v36, 7 }
  0x3c   : > { %p1108_p7 = scmp.lt.s32.totalorder %s543_s8, 4  ;;  %v263_v39 = vld [vmem:[%s1067_s4] sm:$0x3] }
  0x3d   : > { %v267_v38 = vsub.s32 0, %v266_v37  ;;  %v271_v40 = vsub.s32 1, %v266_v37 }
  0x3e   : > { %499 = vmatpush1.bf16.msra.mxu0 %v810_v9 }
  0x3f   : > { %500 = vmatprep.subr.bf16.mxu0 %v811_v10  ;;  %v268_v41 = vrot.slane %v263_v39, %v267_v38  ;;  %v272_v42 = vrot.slane %v263_v39, %v271_v40 }
  0x42   : > { %501 = vmatpush1.bf16.msra.mxu0 %v813_v11 }
  0x43   : > { %502 = vmatprep.subr.bf16.mxu0 %v814_v12 }
  0x46   : > { %503 = vmatpush1.bf16.msra.mxu0 %v816_v13 }
  0x47   : > { %504 = vmatprep.subr.bf16.mxu0 %v817_v14 }
  0x4a   : > { %505 = vmatpush1.bf16.msra.mxu0 %v819_v16 }
  0x4b   : > { %506 = vmatprep.subr.bf16.mxu0 %v820_v17 }
  0x4e   : > { %507 = vmatpush1.bf16.msra.mxu0 %v822_v18 }
  0x4f   : > { %508 = vmatprep.subr.bf16.mxu0 %v823_v19 }
  0x52   : > { %509 = vmatpush2.bf16.msra.mxu0 %v825_v20 }
  0x53   : > { %510 = vmatprep.subr.bf16.mxu0 %v826_v21 }
  0x56   : > { %511 = vmatpush2.bf16.msra.mxu0 %v828_v22 }
  0x57   : > { %512 = vmatprep.subr.bf16.mxu0 %v829_v23 }
  0x5a   : > { %513 = vmatpush2.bf16.msra.mxu0 %v831_v24 }
  0x5b   : > { %514 = vmatprep.subr.bf16.mxu0 %v832_v25 }
  0x5e   : > { %515 = vmatpush2.bf16.msra.mxu0 %v834_v26 }
  0x5f   : > { %516 = vmatprep.subr.bf16.mxu0 %v835_v27 }
  0x62   : > { %517 = vmatpush2.bf16.msra.mxu0 %v837_v28 }
  0x63   : > { %518 = vmatprep.subr.bf16.mxu0 %v838_v29 }
  0x66   : > { %519 = vmatpush2.bf16.msra.mxu0 %v840_v30 }
  0x67   : > { %520 = vmatprep.subr.bf16.mxu0 %v841_v31 }
  0x6a   : > { %521 = vmatpush2.bf16.msra.mxu0 %v843_v32 }
  0x6b   : > { %522 = vmatprep.subr.bf16.mxu0 %v844_v33 }
  0x6e   : > { %523 = vmatpush2.bf16.msra.mxu0 %v846_v34 }
  0x71   : > { %525 = vmatmul.mubr.bf16.vlgmr.msra.gmra.mxu0 %v847_v35 }
 0x131   : > { %v526_v43 = vpop.f32.mrf.mxu0 }
 0x132   : > { %v535_v44 = vadd.f32 %v526_v43, %v268_v41 }
 0x133   : > { %v528_v45 = vpop.f32.mrf.mxu0 }
 0x134   : > { %539 = vst [vmem:[#allocation6] sm:$0xff] %v535_v44  ;;  %v536_v46 = vadd.f32 %v528_v45, %v272_v42 }
 0x135   : > { %v530_v47 = vpop.f32.mrf.mxu0 }
 0x136   : > { %540 = vst [vmem:[#allocation6 + $0x8] sm:$0xff] %v536_v46  ;;  %v537_v48 = vadd.f32 %v530_v47, %v268_v41  ;;  %548 = sbr.rel (!%p1108_p7) target bundleno = 325 (0x145), region = 48 }
 0x137   : > { %v532_v49 = vpop.f32.mrf.mxu0 }
 0x138   : > { %541 = vst [vmem:[#allocation6 + $0x10] sm:$0xff] %v537_v48  ;;  %v538_v50 = vadd.f32 %v532_v49, %v272_v42 }
 0x13a   : > { %542 = vst [vmem:[#allocation6 + $0x18] sm:$0xff] %v538_v50 }
 0x13b   : > { %v549_v51 = vld [vmem:[#allocation6] sm:$0xff] }
 0x13d   : > { %v550_v52 = vld [vmem:[#allocation6 + $0x8] sm:$0xff] }
 0x13e   : > { %v731_v54 = vpack.c.bf16 %v550_v52, %v549_v51 }
 0x13f   : > { %v551_v53 = vld [vmem:[#allocation6 + $0x10] sm:$0xff] }
 0x140   : > { %565 = vst [vmem:[#allocation2] sm:$0xff] %v731_v54 }
 0x141   : > { %v552_v55 = vld [vmem:[#allocation6 + $0x18] sm:$0xff] }
 0x142   : > { %v732_v56 = vpack.c.bf16 %v552_v55, %v551_v53 }
 0x144   : > { %566 = vst [vmem:[#allocation2 + $0x8] sm:$0xff] %v732_v56 }
 0x145 PF: > { %p1117_p10 = scmp.eq.s32.totalorder %s676_s18, 3  ;;  %s961_s10 = smov [#allocation6]  }
 0x146   : > { %s577_s11 = sshll.u32 %s961_s10, 4  ;;  %s578_s11 = int_to_ptr.vmem [resolvable:$true] %s577_s11 }
 0x147   : > { %s878_s12 = scalar_lea.vmem %s578_s11, 512  ;;  %p885_p0 = scmp.lt.s32.totalorder %s578_s11, %s578_s11 }
 0x148   : > { %p879_p11 = scmp.ne.s32.totalorder %s578_s11, %s878_s12  ;;  %p886_p1 = scmp.lt.s32.totalorder %s878_s12, %s878_s12 }
 0x14a   : > { %p880_p12 = pnand %p879_p11, %p1117_p10  ;;  %p887_p2 = por %p886_p1, %p885_p0 }
 0x14c   : > { %p881_p13 = pneg %p880_p12 }
 0x14e   : > { %p888_p3 = pnand %p887_p2, %p881_p13 }
 0x150   : > { %891 = shalt.err (!%p888_p3)
}
 0x151   : > { %s962_s20 = smov 256   ;;  %s963_s18 = smov 16  }
 0x152   : > { %736 = dma.vmem_to_hbm [thread:$0]  (%p1117_p10), %s578_s11, 512, %s1153_s3, [#allocation5], %s962_s20, %s962_s20, %s963_s18  }
 0x153   : > { %931 = dma.done.wait (%p1117_p10), [#allocation5], 512  }
 0x154   : > { %933 = vsyncadd (%p1117_p10), [#allocation5], 4294966784 }
 0x155 PF: > { %s17_s17 = sadd.s32 1, %s956_s17   ;;  %s1159_s12 = smov %s940_s13 }
 0x156   : > { %p14_p4 = scmp.ge.s32.totalorder %s17_s17, 6   ;;  %s1160_s13 = smov %s944_s14 }
 0x157   : > { %s1161_s14 = smov %s1035_s24  ;;  %s1162_s15 = smov %s952_s16 }
 0x158   : > { %s1163_s16 = smov %s1165_s19  ;;  %16 = sbr.rel (!%p14_p4) target bundleno = 5 (0x5), region = 89 }
 0x15d   :  { %593 = vsyncpa [#allocation4], 1 }
 0x15e   :  { %595 = vsyncpa [#allocation4 + $0x1], 1 }
 0x15f   :  { %596 = vsyncpa [#allocation5], 1 }
 0x160   :  { %598 = vsyncpa [#allocation5 + $0x1], 1 }

</bundles_post_ra>
